<compile_context>
chip_gen: v6e
topology: v6e:2x2x1
jax: 0.10.0
libtpu: 0.0.40
codegen_flags: <defaults>
</compile_context>

<pallas_src>
import functools

import jax
import jax.numpy as jnp
import numpy as np
from jax.experimental import pallas as pl
from jax.experimental.pallas import tpu as pltpu

_EPS = 1e-5


# ------------------------------ small helpers ------------------------------ #
def _round_up(v, m):
    return (v + m - 1) // m * m


def _pad_to(x, axis, target):
    size = x.shape[axis]
    if size == target:
        return x
    pads = [(0, 0)] * x.ndim
    pads[axis] = (0, target - size)
    return jnp.pad(x, pads)


def _pick_tile(dim, target, base):
    """Largest multiple of `base` that divides `dim` and is <= target."""
    assert dim % base == 0, (dim, base)
    t = min(dim, target)
    t -= t % base
    while dim % t:
        t -= base
    return t


def _pick_rows(ho, wo, nb, cap=1024):
    """Output rows per conv3x3 block: large enough to feed the MXU (M=rows*Wq),
    bounded for VMEM, and >=2 row blocks when batch==1 (megacore / 2-TC chips)."""
    if nb == 1 and ho > 1:
        cap = min(cap, ((ho + 1) // 2) * wo)
    best = 1
    for t in range(1, ho + 1):
        if ho % t == 0 and t * wo <= cap:
            best = t
    return best


@functools.lru_cache(maxsize=None)
def _vmem_limit_bytes():
    """Per-generation scoped-VMEM budget (review: 96 MiB on v5e/v6e, re-budget
    under v7x's 64 MiB physical, conservative default otherwise)."""
    kind = ""
    try:
        kind = jax.devices()[0].device_kind.lower()
    except Exception:
        pass
    if "v5" in kind or "v6" in kind:
        return 96 * 1024 * 1024
    if "v7" in kind or "7x" in kind:
        return 48 * 1024 * 1024
    return 32 * 1024 * 1024


# --------------------------- tiled fused GEMM kernel ------------------------ #
def _gemm_bn_kernel(*refs, relu, has_residual):
    if has_residual:
        x_ref, w_ref, s_ref, b_ref, r_ref, o_ref, acc_ref = refs
    else:
        x_ref, w_ref, s_ref, b_ref, o_ref, acc_ref = refs
        r_ref = None

    k = pl.program_id(2)

    @pl.when(k == 0)
    def _():
        acc_ref[...] = jnp.zeros_like(acc_ref)

    acc_ref[...] += jnp.dot(x_ref[...], w_ref[...],
                            preferred_element_type=jnp.float32)

    # Epilogue (folded BN affine, residual add, ReLU) only on the last K step.
    @pl.when(k == pl.num_programs(2) - 1)
    def _():
        out = acc_ref[...] * s_ref[...] + b_ref[...]
        if has_residual:
            out = out + r_ref[...].astype(jnp.float32)
        if relu:
            out = jnp.maximum(out, 0.0)
        o_ref[...] = out.astype(o_ref.dtype)


def fused_matmul_bn(x, w, scale, bias, residual=None, relu=True,
                    out_dtype=jnp.float32):
    """out = [relu]((x @ w) * scale + bias [+ residual]); tiled + pipelined."""
    M0, K = x.shape
    Kw, N = w.shape
    assert K == Kw and K % 128 == 0 and N % 128 == 0

    # bf16 packs 16 sublanes per vreg -> keep M and tm 16-aligned.
    M = _round_up(M0, 16)
    if M != M0:
        x = jnp.pad(x, ((0, M - M0), (0, 0)))
        if residual is not None:
            residual = jnp.pad(residual, ((0, M - M0), (0, 0)))

    tm = _pick_tile(M, 1024, 16)
    tn = _pick_tile(N, 512, 128)
    tk = _pick_tile(K, 512, 128)
    grid = (M // tm, N // tn, K // tk)

    in_specs = [
        pl.BlockSpec((tm, tk), lambda i, j, k: (i, k)),
        pl.BlockSpec((tk, tn), lambda i, j, k: (k, j)),
        pl.BlockSpec((1, tn), lambda i, j, k: (0, j)),
        pl.BlockSpec((1, tn), lambda i, j, k: (0, j)),
    ]
    args = [x, w, scale, bias]
    if residual is not None:
        in_specs.append(pl.BlockSpec((tm, tn), lambda i, j, k: (i, j)))
        args.append(residual)

    kernel = functools.partial(_gemm_bn_kernel, relu=relu,
                               has_residual=residual is not None)

    bytes_accessed = (int(x.size) * x.dtype.itemsize
                      + int(w.size) * w.dtype.itemsize
                      + M * N * np.dtype(out_dtype).itemsize
                      + (int(residual.size) * residual.dtype.itemsize
                         if residual is not None else 0))

    out = pl.pallas_call(
        kernel,
        out_shape=jax.ShapeDtypeStruct((M, N), out_dtype),
        grid_spec=pltpu.PrefetchScalarGridSpec(
            num_scalar_prefetch=0,
            grid=grid,
            in_specs=in_specs,
            out_specs=pl.BlockSpec((tm, tn), lambda i, j, k: (i, j)),
            scratch_shapes=[pltpu.VMEM((tm, tn), jnp.float32)]),
        compiler_params=pltpu.CompilerParams(
            dimension_semantics=("parallel", "parallel", "arbitrary"),
            vmem_limit_bytes=_vmem_limit_bytes()),
        cost_estimate=pl.CostEstimate(flops=2 * M * N * K,
                                      transcendentals=0,
                                      bytes_accessed=int(bytes_accessed)),
    )(*args)
    return out[:M0] if M != M0 else out


# ------------------ fused 3x3 conv + BN + ReLU (tap-major matmuls) ---------- #
def _conv3x3_bn_relu_kernel(x_ref, w_ref, sc_ref, bc_ref, o_ref, acc_ref, *,
                            stride):
    # x_ref : (s*s, 1, Hq, Wq, C)   spatial-phase views of the halo-padded image
    # w_ref : (9, C, tco)           tap-major weights
    # o_ref : (1, Th, Wo, tco)
    s = stride
    _, th, wo, tco = o_ref.shape
    wq = x_ref.shape[3]
    cin = x_ref.shape[4]

    rb = pl.program_id(2)
    r0 = pl.multiple_of(rb * th, th)

    acc_ref[...] = jnp.zeros_like(acc_ref)

    # Tap-major, multi-row matmuls: one (Th*Wq, C) x (C, tco) MXU call per tap
    # (9 per row block), accumulating the dw-shifted result slice in VMEM.
    for dh in range(3):
        pr, roff = dh % s, dh // s
        for pc in range(s):
            v = pr * s + pc
            slab = x_ref[v, 0, pl.ds(r0 + roff, th), :, :]          # (Th, Wq, C)
            slab2 = slab.reshape(th * wq, cin)                      # free: Wq%8==0
            for dw in range(pc, 3, s):
                coff = dw // s
                res = jnp.dot(slab2, w_ref[dh * 3 + dw, :, :],
                              preferred_element_type=jnp.float32)
                res = res.reshape(th, wq, tco)
                acc_ref[...] += res[:, coff:coff + wo, :]

    # BN affine + ReLU epilogue; (1,1,tco) scale/bias broadcast implicitly (no
    # explicit (Wo, tco) broadcast_to -> keeps vreg pressure low).
    scale = sc_ref[...].reshape(1, 1, tco)
    bias = bc_ref[...].reshape(1, 1, tco)
    out = jnp.maximum(acc_ref[...] * scale + bias, 0.0)
    o_ref[0] = out.astype(o_ref.dtype)


def fused_conv3x3_bn_relu(phases, w9, scale, bias, stride, ho, wo,
                          out_dtype=jnp.bfloat16):
    s2, nb, hq, wq, cin_p = phases.shape
    cout_p = w9.shape[-1]
    tco = _pick_tile(cout_p, 256, 128)
    th = _pick_rows(ho, wo, nb)
    grid = (nb, cout_p // tco, ho // th)   # row-block innermost: weights & image stay resident

    in_specs = [
        pl.BlockSpec((s2, 1, hq, wq, cin_p), lambda n, j, rb: (0, n, 0, 0, 0)),
        pl.BlockSpec((9, cin_p, tco), lambda n, j, rb: (0, 0, j)),
        pl.BlockSpec((1, tco), lambda n, j, rb: (0, j)),
        pl.BlockSpec((1, tco), lambda n, j, rb: (0, j)),
    ]
    out_specs = pl.BlockSpec((1, th, wo, tco), lambda n, j, rb: (n, rb, 0, j))

    kernel = functools.partial(_conv3x3_bn_relu_kernel, stride=stride)

    flops = 2 * nb * ho * wo * 9 * cin_p * cout_p
    bytes_accessed = (int(phases.size) * phases.dtype.itemsize
                      + int(w9.size) * w9.dtype.itemsize
                      + nb * ho * wo * cout_p * np.dtype(out_dtype).itemsize)

    return pl.pallas_call(
        kernel,
        out_shape=jax.ShapeDtypeStruct((nb, ho, wo, cout_p), out_dtype),
        grid_spec=pltpu.PrefetchScalarGridSpec(
            num_scalar_prefetch=0,
            grid=grid,
            in_specs=in_specs,
            out_specs=out_specs,
            scratch_shapes=[pltpu.VMEM((th, wo, tco), jnp.float32)]),
        compiler_params=pltpu.CompilerParams(
            dimension_semantics=("parallel", "parallel", "parallel"),
            vmem_limit_bytes=_vmem_limit_bytes()),
        cost_estimate=pl.CostEstimate(flops=int(flops), transcendentals=0,
                                      bytes_accessed=int(bytes_accessed)),
    )(phases, w9, scale, bias)


# ------------------------------- JAX glue ----------------------------------- #
def _fold_bn(bn, c_pad):
    gamma, beta, mean, var = (p.astype(jnp.float32) for p in bn)
    scale = gamma / jnp.sqrt(var + _EPS)
    bias = beta - mean * scale
    scale = _pad_to(scale, 0, c_pad).reshape(1, c_pad)
    bias = _pad_to(bias, 0, c_pad).reshape(1, c_pad)
    return scale, bias


def _prep_1x1(w, cin_p, cout_p):
    # OIHW (Co, Ci, 1, 1) -> (Ci_p, Co_p), zero-padded, bf16 MXU operand.
    w2 = jnp.transpose(w[:, :, 0, 0], (1, 0))
    w2 = _pad_to(_pad_to(w2, 0, cin_p), 1, cout_p)
    return w2.astype(jnp.bfloat16)


def _prep_3x3(w, cin_p, cout_p):
    # OIHW (Co, Ci, 3, 3) -> (9, Ci_p, Co_p), tap index = kh*3 + kw, bf16.
    w2 = jnp.transpose(w, (2, 3, 1, 0))                   # (kh, kw, Ci, Co)
    w2 = _pad_to(_pad_to(w2, 2, cin_p), 3, cout_p)
    return w2.reshape(9, cin_p, cout_p).astype(jnp.bfloat16)


def _make_conv2_phases(a1, stride):
    """conv2 input: 1-px halo pad + (s x s) spatial-phase split in one XLA
    rearrange.  Result (s*s, nb, Hq, Wq8, C): every in-kernel tap slice is
    contiguous; phase width padded to a multiple of 8 so the in-kernel reshape
    is layout-preserving."""
    nb, h, w, c = a1.shape
    s = stride
    hp = _round_up(h + 2, s)
    wp = _round_up(w + 2, s)
    xp = jnp.pad(a1, ((0, 0), (1, hp - h - 1), (1, wp - w - 1), (0, 0)))
    hq, wq = hp // s, wp // s
    if s == 1:
        ph = xp[None]
    else:
        ph = xp.reshape(nb, hq, s, wq, s, c)
        ph = jnp.transpose(ph, (2, 4, 0, 1, 3, 5)).reshape(s * s, nb, hq, wq, c)
    wq8 = _round_up(wq, 8)
    if wq8 != wq:
        ph = jnp.pad(ph, ((0, 0), (0, 0), (0, 0), (0, wq8 - wq), (0, 0)))
    return ph


def bottleneck_forward(x_nchw, params, stride):
    nb, cin, h, w = x_nchw.shape
    planes = params["conv1_w"].shape[0]
    cout = params["conv3_w"].shape[0]
    cin_p = _round_up(cin, 128)
    pl_p = _round_up(planes, 128)
    cout_p = _round_up(cout, 128)

    ho = (h - 1) // stride + 1
    wo = (w - 1) // stride + 1

    # NCHW -> NHWC, channels zero-padded to a lane-dense multiple of 128, bf16.
    x_nhwc = jnp.transpose(x_nchw, (0, 2, 3, 1))
    x_bf = _pad_to(x_nhwc, 3, cin_p).astype(jnp.bfloat16)

    # conv1 (1x1) + bn1 + relu  ->  bf16 activation in GEMM row layout.
    w1 = _prep_1x1(params["conv1_w"], cin_p, pl_p)
    s1, b1 = _fold_bn(params["bn1"], pl_p)
    a1 = fused_matmul_bn(x_bf.reshape(nb * h * w, cin_p), w1, s1, b1,
                         relu=True, out_dtype=jnp.bfloat16)
    a1 = a1.reshape(nb, h, w, pl_p)

    # conv2 (3x3, stride, pad=1) + bn2 + relu, im2col fused inside the kernel.
    # TODO(synk): handle the 1-px halo in-kernel (boundary masking) to save the
    #             XLA-side pad/phase pass over a1.
    phases = _make_conv2_phases(a1, stride)
    w2 = _prep_3x3(params["conv2_w"], pl_p, pl_p)
    s2, b2 = _fold_bn(params["bn2"], pl_p)
    a2 = fused_conv3x3_bn_relu(phases, w2, s2, b2, stride, ho, wo,
                               out_dtype=jnp.bfloat16)
    a2 = a2.reshape(nb * ho * wo, pl_p)

    # shortcut: 1x1 strided projection + BN, or identity — kept bf16 end-to-end
    # (no f32 HBM round trip).
    if "sc_w" in params:
        # TODO(synk): gather the strided rows via the GEMM index_map / fuse the
        #             projection into the conv3 pallas_call.
        xs = x_bf[:, ::stride, ::stride, :].reshape(nb * ho * wo, cin_p)
        ws = _prep_1x1(params["sc_w"], cin_p, cout_p)
        ss, bs = _fold_bn(params["sc_bn"], cout_p)
        short = fused_matmul_bn(xs, ws, ss, bs, relu=False,
                                out_dtype=jnp.bfloat16)
    else:
        assert stride == 1 and cin == cout and cin_p == cout_p, (
            "identity shortcut requires stride==1 and in_planes == expansion*planes")
        short = x_bf.reshape(nb * h * w, cin_p)

    # conv3 (1x1) + bn3 + residual add + relu, fused epilogue.
    w3 = _prep_1x1(params["conv3_w"], pl_p, cout_p)
    s3, b3 = _fold_bn(params["bn3"], cout_p)
    out = fused_matmul_bn(a2, w3, s3, b3, residual=short, relu=True,
                          out_dtype=jnp.float32)

    out = out.reshape(nb, ho, wo, cout_p)[:, :, :, :cout]
    return jnp.transpose(out, (0, 3, 1, 2))               # back to NCHW


# ---------------------------- pure-JAX reference ---------------------------- #
def _conv_ref(x, w, stride, pad):
    return jax.lax.conv_general_dilated(
        x, w, (stride, stride), [(pad, pad), (pad, pad)],
        dimension_numbers=("NCHW", "OIHW", "NCHW"))


def _bn_ref(x, bn):
    g, b, m, v = (p[None, :, None, None] for p in bn)
    return g * (x - m) / jnp.sqrt(v + _EPS) + b


def bottleneck_ref(x, params, stride):
    out = jax.nn.relu(_bn_ref(_conv_ref(x, params["conv1_w"], 1, 0), params["bn1"]))
    out = jax.nn.relu(_bn_ref(_conv_ref(out, params["conv2_w"], stride, 1), params["bn2"]))
    out = _bn_ref(_conv_ref(out, params["conv3_w"], 1, 0), params["bn3"])
    if "sc_w" in params:
        short = _bn_ref(_conv_ref(x, params["sc_w"], stride, 0), params["sc_bn"])
    else:
        short = x
    return jax.nn.relu(out + short)


# ----------------------------------- main ----------------------------------- #
def _make_bn(key, c):
    k1, k2, k3, k4 = jax.random.split(key, 4)
    gamma = jax.random.uniform(k1, (c,), jnp.float32, 0.5, 1.5)
    beta = jax.random.normal(k2, (c,), jnp.float32) * 0.1
    mean = jax.random.normal(k3, (c,), jnp.float32) * 0.1
    var = jax.random.uniform(k4, (c,), jnp.float32, 0.5, 1.5)
    return (gamma, beta, mean, var)


def _make_params(key, in_planes, planes, stride, expansion=4):
    ks = jax.random.split(key, 8)
    params = {
        "conv1_w": jax.random.normal(ks[0], (planes, in_planes, 1, 1), jnp.float32) * 0.1,
        "bn1": _make_bn(ks[1], planes),
        "conv2_w": jax.random.normal(ks[2], (planes, planes, 3, 3), jnp.float32) * 0.1,
        "bn2": _make_bn(ks[3], planes),
        "conv3_w": jax.random.normal(ks[4], (expansion * planes, planes, 1, 1), jnp.float32) * 0.1,
        "bn3": _make_bn(ks[5], expansion * planes),
    }
    if stride != 1 or in_planes != expansion * planes:
        params["sc_w"] = jax.random.normal(
            ks[6], (expansion * planes, in_planes, 1, 1), jnp.float32) * 0.1
        params["sc_bn"] = _make_bn(ks[7], expansion * planes)
    return params


def _run_case(key, in_planes, planes, stride, nb, h, w, expansion=4):
    kp, kx = jax.random.split(key)
    params = _make_params(kp, in_planes, planes, stride, expansion)
    x = jax.random.normal(kx, (nb, in_planes, h, w), jnp.float32)

    out = jax.block_until_ready(bottleneck_forward(x, params, stride))
    ref = jax.block_until_ready(bottleneck_ref(x, params, stride))

    ho = (h - 1) // stride + 1
    wo = (w - 1) // stride + 1
    if out.shape != (nb, expansion * planes, ho, wo):
        raise RuntimeError(f"bad output shape {out.shape}")
    # bf16 MXU operands + bf16 residual (f32 accumulation) vs f32 reference ->
    # loosened tolerance; acceptable for inference.
    if not np.allclose(np.asarray(out), np.asarray(ref), atol=4e-2, rtol=4e-2):
        err = np.max(np.abs(np.asarray(out) - np.asarray(ref)))
        raise RuntimeError(f"Pallas output does not match reference (max err {err})")


if __name__ == "__main__":
    key = jax.random.PRNGKey(0)
    k1, k2 = jax.random.split(key)
    # Projection-shortcut path (stride 2).
    _run_case(k1, in_planes=16, planes=8, stride=2, nb=2, h=8, w=8)
    # Identity-shortcut path (stride 1, in_planes == expansion * planes).
    _run_case(k2, in_planes=32, planes=8, stride=1, nb=2, h=8, w=8)
    print("KERNEL_OK")
</pallas_src>

<mosaic_0001>
module attributes {stable_mosaic.version = 11 : i64} {
  func.func @_gemm_bn_kernel(%arg0: i32, %arg1: i32, %arg2: i32, %arg3: memref<128x128xbf16, #tpu.memory_space<vmem>>, %arg4: memref<128x128xbf16, #tpu.memory_space<vmem>>, %arg5: memref<1x128xf32, #tpu.memory_space<vmem>>, %arg6: memref<1x128xf32, #tpu.memory_space<vmem>>, %arg7: memref<128x128xbf16, #tpu.memory_space<vmem>>, %arg8: memref<128x128xf32, #tpu.memory_space<vmem>>) attributes {dimension_semantics = [#tpu.dimension_semantics<parallel>, #tpu.dimension_semantics<parallel>, #tpu.dimension_semantics<arbitrary>], iteration_bounds = array<i64: 1, 1, 1>, scalar_prefetch = 0 : i64, scratch_operands = 1 : i64, tpu.core_type = #tpu.core_type<tc>, window_params = [{transform_indices = @transform_0, window_bounds = array<i64: 128, 128>}, {transform_indices = @transform_1, window_bounds = array<i64: 128, 128>}, {transform_indices = @transform_2, window_bounds = array<i64: 1, 128>}, {transform_indices = @transform_3, window_bounds = array<i64: 1, 128>}, {transform_indices = @transform_4, window_bounds = array<i64: 128, 128>}]} {
    %c0_i32 = arith.constant 0 : i32
    %0 = arith.cmpi eq, %arg2, %c0_i32 : i32
    %1 = arith.extui %0 : i1 to i32
    %c0_i32_0 = arith.constant 0 : i32
    %2 = arith.cmpi ne, %1, %c0_i32_0 : i32
    scf.if %2 {
      %cst_10 = arith.constant 0.000000e+00 : f32
      %12 = vector.broadcast %cst_10 : f32 to vector<128x128xf32>
      %c0_11 = arith.constant 0 : index
      %c0_12 = arith.constant 0 : index
      %13 = vector.load %arg8[%c0_11, %c0_12] : memref<128x128xf32, #tpu.memory_space<vmem>>, vector<128x128xf32>
      tpu.vector_store %arg8[%c0_11, %c0_12], %12 {strides = array<i32>} : memref<128x128xf32, #tpu.memory_space<vmem>>, vector<128x128xf32>,
    } else {
    }
    %c0 = arith.constant 0 : index
    %c0_1 = arith.constant 0 : index
    %3 = vector.load %arg8[%c0, %c0_1] : memref<128x128xf32, #tpu.memory_space<vmem>>, vector<128x128xf32>
    %c0_2 = arith.constant 0 : index
    %c0_3 = arith.constant 0 : index
    %4 = vector.load %arg3[%c0_2, %c0_3] : memref<128x128xbf16, #tpu.memory_space<vmem>>, vector<128x128xbf16>
    %c0_4 = arith.constant 0 : index
    %c0_5 = arith.constant 0 : index
    %5 = vector.load %arg4[%c0_4, %c0_5] : memref<128x128xbf16, #tpu.memory_space<vmem>>, vector<128x128xbf16>
    %cst = arith.constant dense<0.000000e+00> : vector<128x128xf32>
    %6 = tpu.matmul %4, %5, %cst {dimension_numbers = #tpu.dot_dimension_numbers<[1], [0], [0], [1], [0, 0, 1, 1], [], []>} : vector<128x128xbf16>, vector<128x128xbf16>, vector<128x128xf32> -> vector<128x128xf32>
    %7 = arith.addf %3, %6 : vector<128x128xf32>
    %c0_6 = arith.constant 0 : index
    %c0_7 = arith.constant 0 : index
    %8 = vector.load %arg8[%c0_6, %c0_7] : memref<128x128xf32, #tpu.memory_space<vmem>>, vector<128x128xf32>
    tpu.vector_store %arg8[%c0_6, %c0_7], %7 {strides = array<i32>} : memref<128x128xf32, #tpu.memory_space<vmem>>, vector<128x128xf32>,
    %c0_i32_8 = arith.constant 0 : i32
    %9 = arith.cmpi eq, %arg2, %c0_i32_8 : i32
    %10 = arith.extui %9 : i1 to i32
    %c0_i32_9 = arith.constant 0 : i32
    %11 = arith.cmpi ne, %10, %c0_i32_9 : i32
    scf.if %11 {
      %c0_10 = arith.constant 0 : index
      %c0_11 = arith.constant 0 : index
      %12 = vector.load %arg8[%c0_10, %c0_11] : memref<128x128xf32, #tpu.memory_space<vmem>>, vector<128x128xf32>
      %c0_12 = arith.constant 0 : index
      %c0_13 = arith.constant 0 : index
      %13 = vector.load %arg5[%c0_12, %c0_13] : memref<1x128xf32, #tpu.memory_space<vmem>>, vector<1x128xf32>
      %14 = vector.broadcast %13 : vector<1x128xf32> to vector<128x128xf32>
      %15 = arith.mulf %12, %14 : vector<128x128xf32>
      %c0_14 = arith.constant 0 : index
      %c0_15 = arith.constant 0 : index
      %16 = vector.load %arg6[%c0_14, %c0_15] : memref<1x128xf32, #tpu.memory_space<vmem>>, vector<1x128xf32>
      %17 = vector.broadcast %16 : vector<1x128xf32> to vector<128x128xf32>
      %18 = arith.addf %15, %17 : vector<128x128xf32>
      %cst_16 = arith.constant 0.000000e+00 : f32
      %19 = vector.broadcast %cst_16 : f32 to vector<128x128xf32>
      %20 = arith.maximumf %18, %19 : vector<128x128xf32>
      %21 = arith.truncf %20 : vector<128x128xf32> to vector<128x128xbf16>
      %c0_17 = arith.constant 0 : index
      %c0_18 = arith.constant 0 : index
      %22 = vector.load %arg7[%c0_17, %c0_18] : memref<128x128xbf16, #tpu.memory_space<vmem>>, vector<128x128xbf16>
      tpu.vector_store %arg7[%c0_17, %c0_18], %21 {strides = array<i32>} : memref<128x128xbf16, #tpu.memory_space<vmem>>, vector<128x128xbf16>,
    } else {
    }
    return
  }
  func.func @transform_0(%arg0: i32, %arg1: i32, %arg2: i32) -> (i32, i32) {
    %c0_i32 = arith.constant 0 : i32
    return %arg0, %arg2 : i32, i32
  }
  func.func @transform_1(%arg0: i32, %arg1: i32, %arg2: i32) -> (i32, i32) {
    %c0_i32 = arith.constant 0 : i32
    return %arg2, %arg1 : i32, i32
  }
  func.func @transform_2(%arg0: i32, %arg1: i32, %arg2: i32) -> (i32, i32) {
    %c0_i32 = arith.constant 0 : i32
    %c0_i32_0 = arith.constant 0 : i32
    return %c0_i32, %arg1 : i32, i32
  }
  func.func @transform_3(%arg0: i32, %arg1: i32, %arg2: i32) -> (i32, i32) {
    %c0_i32 = arith.constant 0 : i32
    %c0_i32_0 = arith.constant 0 : i32
    return %c0_i32, %arg1 : i32, i32
  }
  func.func @transform_4(%arg0: i32, %arg1: i32, %arg2: i32) -> (i32, i32) {
    %c0_i32 = arith.constant 0 : i32
    return %arg0, %arg1 : i32, i32
  }
}

</mosaic_0001>

<bundles_post_ra>
// kernel: tpu_custom_call.1
= control target key start
LH: loop header
LB: loop body
LE: loop exit
PB: predicated region body
PF: predicated region fallthrough
CT: control target
= control target key end

     0   :  { %9 = vsyncpa [#allocation4], 0  ;;  %s821_s0 = inlined_call_operand.hbm [shape: bf16[128,128], index: 0, kind: input, shape index: {}]   ;;  %s822_s1 = inlined_call_operand.hbm [shape: bf16[128,128], index: 1, kind: input, shape index: {}]   ;;  %s823_s2 = inlined_call_operand.vmem [shape: f32[1,128], index: 2, kind: input, shape index: {}]   ;;  %s824_s3 = inlined_call_operand.vmem [shape: f32[1,128], index: 3, kind: input, shape index: {}]   ;;  %s825_s4 = inlined_call_operand.hbm [shape: bf16[128,128], index: 4, kind: output, shape index: {}]  }
   0x1   :  { %10 = vsyncpa [#allocation7], 0 }
   0x2   :  { %11 = vsyncpa [#allocation5], 0  ;;  %s767_s15 = smov [#allocation3]  }
   0x3   :  { %s17_s16 = sshll.u32 %s767_s15, 4  ;;  %s18_s16 = int_to_ptr.vmem [resolvable:$true] %s17_s16 }
   0x4   :  { %s709_s17 = scalar_lea.vmem %s18_s16, 1024  ;;  %p714_p1 = scmp.lt.s32.totalorder %s18_s16, %s18_s16 }
   0x5   :  { %p710_p0 = scmp.ne.s32.totalorder %s18_s16, %s709_s17  ;;  %p715_p2 = scmp.lt.s32.totalorder %s709_s17, %s709_s17 }
   0x7   :  { %p716_p3 = por %p715_p2, %p714_p1 }
   0x9   :  { %p717_p4 = pnand %p716_p3, %p710_p0 }
   0xb   :  { %720 = shalt.err (!%p717_p4)
}
   0xc   :  { %s768_s18 = smov 64   ;;  %s769_s19 = smov 4  }
   0xd   :  { %23 = dma.hbm_to_vmem [thread:$0]  %s821_s0, 1024, %s18_s16, [#allocation4], %s768_s18, %s768_s18, %s769_s19  }
   0xe   :  { %s770_s22 = smov [#allocation6]  }
   0xf   :  { %s29_s23 = sshll.u32 %s770_s22, 4  ;;  %s30_s23 = int_to_ptr.vmem [resolvable:$true] %s29_s23 }
  0x10   :  { %s729_s24 = scalar_lea.vmem %s30_s23, 1024  ;;  %p734_p6 = scmp.lt.s32.totalorder %s30_s23, %s30_s23 }
  0x11   :  { %p730_p5 = scmp.ne.s32.totalorder %s30_s23, %s729_s24  ;;  %p735_p7 = scmp.lt.s32.totalorder %s729_s24, %s729_s24 }
  0x13   :  { %p736_p8 = por %p735_p7, %p734_p6 }
  0x15   :  { %p737_p9 = pnand %p736_p8, %p730_p5 }
  0x17   :  { %740 = shalt.err (!%p737_p9)
}
  0x18   :  { %35 = dma.hbm_to_vmem [thread:$0]  %s822_s1, 1024, %s30_s23, [#allocation7], %s768_s18, %s768_s18, %s769_s19  }
  0x19   :  { %761 = dma.done.wait [#allocation4], 1024  }
  0x1a   :  { %762 = vsyncadd [#allocation4], 4294966272 }
  0x1b   :  { %763 = dma.done.wait [#allocation7], 1024  }
  0x1c   :  { %764 = vsyncadd [#allocation7], 4294966272  ;;  %v685_v0 = vld [vmem:[#allocation6 + $0x38] sm:$0xff]   ;;  %v686_v1 = vld [vmem:[#allocation6 + $0x30] sm:$0xff]  }
  0x1d   :  { %632 = vmatprep.subr.bf16.mxu0 %v685_v0  ;;  %664 = vmatprep.subr.bf16.mxu1 %v685_v0  ;;  %v687_v2 = vld [vmem:[#allocation6 + $0x28] sm:$0xff]   ;;  %v688_v3 = vld [vmem:[#allocation6 + $0x20] sm:$0xff]   ;;  %v689_v6 = vld [vmem:[#allocation6 + $0x18] sm:$0xff]  }
  0x1e   :  { %633 = vmatpush3.bf16.msra.mxu0 %v685_v0  ;;  %672 = vmatpush3.bf16.msra.mxu1 %v685_v0  ;;  %v693_v4 = vld [vmem:[#allocation3] sm:$0xff]   ;;  %v690_v7 = vld [vmem:[#allocation6 + $0x10] sm:$0xff]   ;;  %v691_v8 = vld [vmem:[#allocation6 + $0x8] sm:$0xff]  }
  0x1f   :  { %634 = vmatprep.subr.bf16.mxu0 %v686_v1  ;;  %665 = vmatprep.subr.bf16.mxu1 %v686_v1  ;;  %v694_v5 = vld [vmem:[#allocation3 + $0x20] sm:$0xff]   ;;  %v695_v10 = vld [vmem:[#allocation3 + $0x8] sm:$0xff]   ;;  %v697_v12 = vld [vmem:[#allocation3 + $0x10] sm:$0xff]  }
  0x20   :  { %648 = vmatprep.mubr.bf16.mxu0 %v693_v4  ;;  %656 = vmatprep.mubr.bf16.mxu1 %v694_v5  ;;  %v692_v9 = vld [vmem:[#allocation6] sm:$0xff]   ;;  %v696_v11 = vld [vmem:[#allocation3 + $0x28] sm:$0xff]   ;;  %v698_v13 = vld [vmem:[#allocation3 + $0x30] sm:$0xff]  }
  0x21   :  { %v699_v14 = vld [vmem:[#allocation3 + $0x18] sm:$0xff]   ;;  %v535_v16 = vld [vmem:[%s823_s2] ss:$0 sm:$0xff]  ;;  %s771_s2 = smov [#allocation8]  }
  0x22   :  { %635 = vmatpush3.bf16.msra.mxu0 %v686_v1  ;;  %673 = vmatpush3.bf16.msra.mxu1 %v686_v1  ;;  %v700_v15 = vld [vmem:[#allocation3 + $0x38] sm:$0xff]   ;;  %v536_v21 = vld [vmem:[%s824_s3] ss:$0 sm:$0xff]  ;;  %s506_s3 = sshll.u32 %s771_s2, 4  ;;  %s507_s3 = int_to_ptr.vmem [resolvable:$true] %s506_s3 }
  0x23   :  { %636 = vmatprep.subr.bf16.mxu0 %v687_v2  ;;  %666 = vmatprep.subr.bf16.mxu1 %v687_v2  ;;  %s741_s29 = scalar_lea.vmem %s507_s3, 1024  ;;  %p746_p11 = scmp.lt.s32.totalorder %s507_s3, %s507_s3 }
  0x24   :  { %p742_p10 = scmp.ne.s32.totalorder %s507_s3, %s741_s29  ;;  %p747_p12 = scmp.lt.s32.totalorder %s741_s29, %s741_s29 }
  0x26   :  { %637 = vmatpush3.bf16.msra.mxu0 %v687_v2  ;;  %674 = vmatpush3.bf16.msra.mxu1 %v687_v2  ;;  %p748_p13 = por %p747_p12, %p746_p11 }
  0x27   :  { %638 = vmatprep.subr.bf16.mxu0 %v688_v3  ;;  %667 = vmatprep.subr.bf16.mxu1 %v688_v3 }
  0x28   :  { %p749_p0 = pnand %p748_p13, %p742_p10 }
  0x2a   :  { %639 = vmatpush3.bf16.msra.mxu0 %v688_v3  ;;  %675 = vmatpush3.bf16.msra.mxu1 %v688_v3 }
  0x2b   :  { %640 = vmatprep.subr.bf16.mxu0 %v689_v6  ;;  %668 = vmatprep.subr.bf16.mxu1 %v689_v6 }
  0x2e   :  { %641 = vmatpush3.bf16.msra.mxu0 %v689_v6  ;;  %676 = vmatpush3.bf16.msra.mxu1 %v689_v6 }
  0x2f   :  { %642 = vmatprep.subr.bf16.mxu0 %v690_v7  ;;  %669 = vmatprep.subr.bf16.mxu1 %v690_v7 }
  0x32   :  { %643 = vmatpush3.bf16.msra.mxu0 %v690_v7  ;;  %677 = vmatpush3.bf16.msra.mxu1 %v690_v7 }
  0x33   :  { %644 = vmatprep.subr.bf16.mxu0 %v691_v8  ;;  %670 = vmatprep.subr.bf16.mxu1 %v691_v8 }
  0x36   :  { %645 = vmatpush3.bf16.msra.mxu0 %v691_v8  ;;  %678 = vmatpush3.bf16.msra.mxu1 %v691_v8 }
  0x37   :  { %646 = vmatprep.subr.bf16.mxu0 %v692_v9  ;;  %671 = vmatprep.subr.bf16.mxu1 %v692_v9 }
  0x3a   :  { %647 = vmatpush3.bf16.msra.mxu0 %v692_v9  ;;  %679 = vmatpush3.bf16.msra.mxu1 %v692_v9 }
  0x3d   :  { %649 = vmatmul.mubr.bf16.vlgmr.msra.gmra.mxu0 %v695_v10  ;;  %657 = vmatmul.mubr.bf16.vlgmr.msra.gmra.mxu1 %v696_v11 }
  0x3e   :  { %652 = vmatprep.mubr.bf16.mxu0 %v697_v12  ;;  %660 = vmatprep.mubr.bf16.mxu1 %v698_v13 }
  0x45   :  { %653 = vmatmul.mubr.bf16.gmra.mxu0 %v699_v14  ;;  %661 = vmatmul.mubr.bf16.gmra.mxu1 %v700_v15 }
  0xfd   :  { %v650_v17 = vpop.f32.mrf.mxu0  ;;  %v658_v18 = vpop.f32.mrf.mxu1 }
  0xfe   :  { %v368_v19 = vmul.f32 %v650_v17, %v535_v16  ;;  %v376_v20 = vmul.f32 %v658_v18, %v535_v16 }
  0xff   :  { %v245_v22 = vpop.f32.mrf.mxu0  ;;  %v277_v23 = vpop.f32.mrf.mxu1 }
 0x100   :  { %v366_v24 = vmul.f32 %v535_v16, %v245_v22  ;;  %v374_v25 = vmul.f32 %v535_v16, %v277_v23  ;;  %v391_v28 = vadd.f32 %v536_v21, %v368_v19  ;;  %v399_v29 = vadd.f32 %v536_v21, %v376_v20 }
 0x101   :  { %v651_v26 = vpop.f32.mrf.mxu0  ;;  %v659_v27 = vpop.f32.mrf.mxu1 }
 0x102   :  { %v369_v30 = vmul.f32 %v651_v26, %v535_v16  ;;  %v377_v31 = vmul.f32 %v659_v27, %v535_v16  ;;  %v389_v34 = vadd.f32 %v536_v21, %v366_v24  ;;  %v397_v35 = vadd.f32 %v536_v21, %v374_v25 }
 0x103   :  { %v248_v32 = vpop.f32.mrf.mxu0  ;;  %v280_v33 = vpop.f32.mrf.mxu1  ;;  %v407_v42 = vmax.f32 %v391_v28, 0.0  ;;  %v415_v43 = vmax.f32 %v399_v29, 0.0 }
 0x104   :  { %v367_v36 = vmul.f32 %v535_v16, %v248_v32  ;;  %v375_v37 = vmul.f32 %v535_v16, %v280_v33  ;;  %v392_v38 = vadd.f32 %v536_v21, %v369_v30  ;;  %v400_v39 = vadd.f32 %v536_v21, %v377_v31 }
 0x105   :  { %v654_v40 = vpop.f32.mrf.mxu0  ;;  %v662_v41 = vpop.f32.mrf.mxu1  ;;  %v405_v52 = vmax.f32 %v389_v34, 0.0  ;;  %v413_v53 = vmax.f32 %v397_v35, 0.0 }
 0x106   :  { %v390_v44 = vadd.f32 %v536_v21, %v367_v36  ;;  %v398_v45 = vadd.f32 %v536_v21, %v375_v37  ;;  %v408_v46 = vmax.f32 %v392_v38, 0.0  ;;  %v416_v47 = vmax.f32 %v400_v39, 0.0 }
 0x107   :  { %v372_v48 = vmul.f32 %v654_v40, %v535_v16  ;;  %v380_v49 = vmul.f32 %v662_v41, %v535_v16  ;;  %v261_v50 = vpop.f32.mrf.mxu0  ;;  %v293_v51 = vpop.f32.mrf.mxu1 }
 0x108   :  { %v406_v54 = vmax.f32 %v390_v44, 0.0  ;;  %v414_v55 = vmax.f32 %v398_v45, 0.0  ;;  %v577_v56 = vpack.c.bf16 %v408_v46, %v407_v42  ;;  %v597_v57 = vpack.c.bf16 %v416_v47, %v415_v43 }
 0x109   :  { %v370_v58 = vmul.f32 %v535_v16, %v261_v50  ;;  %v378_v59 = vmul.f32 %v535_v16, %v293_v51  ;;  %v655_v60 = vpop.f32.mrf.mxu0  ;;  %v663_v61 = vpop.f32.mrf.mxu1  ;;  %v395_v0 = vadd.f32 %v536_v21, %v372_v48  ;;  %v403_v1 = vadd.f32 %v536_v21, %v380_v49 }
 0x10a   :  { %v572_v62 = vpack.c.bf16 %v406_v54, %v405_v52  ;;  %v592_v63 = vpack.c.bf16 %v414_v55, %v413_v53  ;;  %609 = vst [vmem:[#allocation8 + $0x8] sm:$0xff] %v577_v56   ;;  %613 = vst [vmem:[#allocation8 + $0x28] sm:$0xff] %v597_v57   ;;  %v373_v2 = vmul.f32 %v655_v60, %v535_v16 }
 0x10b   :  { %v381_v3 = vmul.f32 %v663_v61, %v535_v16  ;;  %v264_v4 = vpop.f32.mrf.mxu0  ;;  %v296_v5 = vpop.f32.mrf.mxu1  ;;  %v393_v6 = vadd.f32 %v536_v21, %v370_v58  ;;  %v401_v7 = vadd.f32 %v536_v21, %v378_v59  ;;  %v411_v14 = vmax.f32 %v395_v0, 0.0 }
 0x10c   :  { %573 = vst [vmem:[#allocation8] sm:$0xff] %v572_v62   ;;  %612 = vst [vmem:[#allocation8 + $0x20] sm:$0xff] %v592_v63   ;;  %v371_v8 = vmul.f32 %v535_v16, %v264_v4  ;;  %v379_v9 = vmul.f32 %v535_v16, %v296_v5  ;;  %v396_v10 = vadd.f32 %v536_v21, %v373_v2  ;;  %v419_v15 = vmax.f32 %v403_v1, 0.0 }
 0x10d   :  { %v404_v11 = vadd.f32 %v536_v21, %v381_v3  ;;  %v409_v19 = vmax.f32 %v393_v6, 0.0  ;;  %v417_v20 = vmax.f32 %v401_v7, 0.0 }
 0x10e   :  { %v394_v12 = vadd.f32 %v536_v21, %v371_v8  ;;  %v402_v13 = vadd.f32 %v536_v21, %v379_v9  ;;  %v412_v17 = vmax.f32 %v396_v10, 0.0 }
 0x10f   :  { %v420_v18 = vmax.f32 %v404_v11, 0.0 }
 0x110   :  { %v410_v22 = vmax.f32 %v394_v12, 0.0  ;;  %v418_v23 = vmax.f32 %v402_v13, 0.0  ;;  %v587_v24 = vpack.c.bf16 %v412_v17, %v411_v14 }
 0x111   :  { %v607_v25 = vpack.c.bf16 %v420_v18, %v419_v15 }
 0x112   :  { %v582_v26 = vpack.c.bf16 %v410_v22, %v409_v19  ;;  %v602_v27 = vpack.c.bf16 %v418_v23, %v417_v20  ;;  %611 = vst [vmem:[#allocation8 + $0x18] sm:$0xff] %v587_v24  }
 0x113   :  { %615 = vst [vmem:[#allocation8 + $0x38] sm:$0xff] %v607_v25  }
 0x114   :  { %610 = vst [vmem:[#allocation8 + $0x10] sm:$0xff] %v582_v26   ;;  %614 = vst [vmem:[#allocation8 + $0x30] sm:$0xff] %v602_v27  }
 0x115   :  { %752 = shalt.err (!%p749_p0)
}
 0x116   :  { %512 = dma.vmem_to_hbm [thread:$0]  %s507_s3, 1024, %s825_s4, [#allocation5], %s768_s18, %s768_s18, %s769_s19  }
 0x117   :  { %765 = dma.done.wait [#allocation5], 1024  }
 0x118   :  { %766 = vsyncadd [#allocation5], 4294966272 }
 0x119   :  { %516 = vsyncpa [#allocation4], 1 }
 0x11a   :  { %517 = vsyncpa [#allocation7], 1 }
 0x11b   :  { %518 = vsyncpa [#allocation5], 1 }

</bundles_post_ra>
